<compile_context>
chip_gen: v5e
topology: v5e:2x2
jax: 0.10.0
libtpu: 0.0.40
codegen_flags: <defaults>
</compile_context>

<pallas_src>
import functools

import numpy as np

import jax
import jax.numpy as jnp
from jax import lax
from jax.experimental import pallas as pl
from jax.experimental.pallas import tpu as pltpu

K = 7            # conv kernel size (module default)
PAD = K // 2     # 'same' padding
KK = K * K


def _round_up(n, m):
    return -(-n // m) * m


# --------------------------------------------------------------------------
# Kernels
# --------------------------------------------------------------------------

def _spatial_attn_matmul_kernel(b_ref, wmat_ref, x_ref, o_ref):
    """Small-H*W path: 7x7 'same' conv over the two pooled maps as one MXU
    matmul against a precomputed banded matrix.

    b_ref:    (1,)            f32 SMEM
    wmat_ref: (2*HWp, HWp)    f32 VMEM (banded conv matrix, [avg | max] rows)
    x_ref / o_ref: (BB, C, HWp) VMEM block (lane-dense last dim)
    """
    xv = x_ref[...]                                        # load block once
    avg = jnp.mean(xv, axis=1, dtype=jnp.float32)          # f32 accumulation
    mx = jnp.max(xv, axis=1).astype(jnp.float32)           # max exact in bf16
    pooled = jnp.concatenate([avg, mx], axis=-1)           # (BB, 2*HWp) f32
    conv = jnp.dot(pooled, wmat_ref[...],
                   preferred_element_type=jnp.float32)     # (BB, HWp)
    attn = jax.nn.sigmoid(conv + b_ref[0])                 # (BB, HWp) f32
    # f32 multiply (safe on v5e, no full f32 slab kept live), cast on store.
    o_ref[...] = (xv.astype(jnp.float32) * attn[:, None, :]).astype(o_ref.dtype)


def _spatial_attn_shift_kernel(w_ref, b_ref, x_ref, o_ref, *, W, base):
    """Large-H*W fallback: factored shift-and-mask conv.
    14 row-shifted slabs + 7 column shifts (21 lane rotations total).

    w_ref: (2*K*K,) f32 SMEM  -- flattened conv weight, [avg-ch | max-ch]
    b_ref: (1,)     f32 SMEM
    x_ref / o_ref: (BB, C, HWp) VMEM block (lane-dense last dim)
    """
    xv = x_ref[...]
    HWp = xv.shape[-1]
    avg = jnp.mean(xv, axis=1, dtype=jnp.float32)           # (BB, HWp)
    mx = jnp.max(xv, axis=1).astype(jnp.float32)            # (BB, HWp)
    BB = avg.shape[0]

    # Zero-pad the flat pooled maps with `base` (>= PAD*W + PAD, lane-aligned)
    # zeros on both sides: row out-of-bounds lands in the zero region;
    # column out-of-bounds handled by per-dw masks below.
    zpad = jnp.zeros((BB, base), jnp.float32)
    avg_p = jnp.concatenate([zpad, avg, zpad], axis=-1)
    mx_p = jnp.concatenate([zpad, mx, zpad], axis=-1)

    # 14 row-shifted slabs (width HWp + 2*PAD), materialized once.
    r_avg, r_mx = [], []
    for kh in range(K):
        off = base + (kh - PAD) * W - PAD
        r_avg.append(avg_p[:, off:off + HWp + 2 * PAD])
        r_mx.append(mx_p[:, off:off + HWp + 2 * PAD])

    col = lax.broadcasted_iota(jnp.int32, (1, HWp), 1) % W
    acc = jnp.full((BB, HWp), b_ref[0], dtype=jnp.float32)
    for kw in range(K):
        dw = kw - PAD
        t = jnp.zeros((BB, HWp + 2 * PAD), jnp.float32)
        for kh in range(K):                                  # VALU only
            t = t + w_ref[kh * K + kw] * r_avg[kh]
            t = t + w_ref[KK + kh * K + kw] * r_mx[kh]
        inner = t[:, PAD + dw:PAD + dw + HWp]                # one column shift
        if dw < 0:
            inner = jnp.where(col >= -dw, inner, 0.0)
        elif dw > 0:
            inner = jnp.where(col < (W - dw), inner, 0.0)
        acc = acc + inner

    attn = jax.nn.sigmoid(acc)
    o_ref[...] = (xv.astype(jnp.float32) * attn[:, None, :]).astype(o_ref.dtype)


# --------------------------------------------------------------------------
# Host-side helpers
# --------------------------------------------------------------------------

def _device_kind():
    try:
        return jax.devices()[0].device_kind.lower()
    except Exception:
        return ""


def _is_v7():
    kind = _device_kind()
    return ("v7" in kind) or ("tpu7" in kind)


def _min_grid_steps():
    # v7x has 2 TensorCores and the batch axis is "parallel": keep >=2 steps
    # per core so each core's block DMA overlaps compute.  Single-TC chips
    # (v5e/v6e) get no benefit from a forced split.
    return 4 if _is_v7() else 1


def _pick_block_batch(batch, per_img_bytes, target_bytes, min_steps):
    """Largest divisor of `batch` whose block fits `target_bytes`, while
    keeping at least `min_steps` grid steps (when batch allows)."""
    need_steps = min(min_steps, batch)
    best = 1
    for d in range(1, batch + 1):
        if batch % d:
            continue
        if d > 1 and d * per_img_bytes > target_bytes:
            continue
        if batch // d < need_steps:
            continue
        best = d
    return best


def _conv_matrix_indices(H, W, HWp):
    """Static scatter indices for the banded 'same' conv matrix."""
    rows, cols, widx = [], [], []
    ohg, owg = np.meshgrid(np.arange(H), np.arange(W), indexing="ij")
    out_idx = (ohg * W + owg)
    for c in range(2):
        for kh in range(K):
            for kw in range(K):
                ih, iw = ohg + (kh - PAD), owg + (kw - PAD)
                valid = (ih >= 0) & (ih < H) & (iw >= 0) & (iw < W)
                rows.append((c * HWp + ih * W + iw)[valid])
                cols.append(out_idx[valid])
                widx.append(np.full(int(valid.sum()), c * KK + kh * K + kw,
                                    dtype=np.int32))
    return (np.concatenate(rows).astype(np.int32),
            np.concatenate(cols).astype(np.int32),
            np.concatenate(widx))


def _build_conv_matrix(weight, H, W, HWp):
    """(2*HWp, HWp) f32 matrix M such that [avg|max] @ M == conv2d('same')."""
    rows, cols, widx = _conv_matrix_indices(H, W, HWp)
    wflat = weight.astype(jnp.float32).reshape(-1)          # (2*K*K,)
    vals = wflat[jnp.asarray(widx)]
    m = jnp.zeros((2 * HWp, HWp), jnp.float32)
    return m.at[jnp.asarray(rows), jnp.asarray(cols)].set(vals)


def spatial_attention(x, weight, bias, *, block_target_bytes=2 * 1024 * 1024,
                      conv_path="auto"):
    """x: (B, C, H, W) NCHW; weight: (1, 2, K, K); bias: (1,).

    conv_path: "auto" (matmul conv when H*W <= 1024, else shift conv),
               "matmul", or "shift".
    """
    B, C, H, W = x.shape
    HW = H * W
    HWp = _round_up(HW, 128)          # keep stores lane-dense for any H*W

    x_flat = x.reshape(B, C, HW)
    if HWp != HW:
        x_flat = jnp.pad(x_flat, ((0, 0), (0, 0), (0, HWp - HW)))

    bias_f = bias.astype(jnp.float32).reshape(-1)           # (1,)

    use_matmul = (conv_path == "matmul") or (conv_path == "auto" and HWp <= 1024)

    per_img = C * HWp * x.dtype.itemsize
    BB = _pick_block_batch(B, per_img, block_target_bytes, _min_grid_steps())
    grid = (B // BB,)

    blk_bytes = BB * per_img
    wmat_bytes = 2 * HWp * HWp * 4 if use_matmul else 0
    temp_bytes = 32 * BB * HWp * 4
    vmem_cap = (56 if _is_v7() else 100) * 1024 * 1024
    vmem_limit = int(min(vmem_cap,
                         max(16 * 1024 * 1024,
                             8 * blk_bytes + 2 * wmat_bytes + temp_bytes
                             + (2 << 20))))

    x_spec = pl.BlockSpec((BB, C, HWp), lambda i: (i, 0, 0))
    out_spec = pl.BlockSpec((BB, C, HWp), lambda i: (i, 0, 0))
    cp = pltpu.CompilerParams(dimension_semantics=("parallel",),
                              vmem_limit_bytes=vmem_limit)

    if use_matmul:
        wmat = _build_conv_matrix(weight, H, W, HWp)
        kernel = _spatial_attn_matmul_kernel
        in_specs = [
            pl.BlockSpec(memory_space=pltpu.MemorySpace.SMEM),      # bias
            pl.BlockSpec((2 * HWp, HWp), lambda i: (0, 0)),         # conv mat
            x_spec,
        ]
        args = (bias_f, wmat, x_flat)
    else:
        base = _round_up(PAD * W + PAD, 128)        # lane-aligned zero pad
        w_flat = weight.astype(jnp.float32).reshape(-1)              # (98,)
        kernel = functools.partial(_spatial_attn_shift_kernel, W=W, base=base)
        in_specs = [
            pl.BlockSpec(memory_space=pltpu.MemorySpace.SMEM),      # weights
            pl.BlockSpec(memory_space=pltpu.MemorySpace.SMEM),      # bias
            x_spec,
        ]
        args = (w_flat, bias_f, x_flat)

    out_flat = pl.pallas_call(
        kernel,
        out_shape=jax.ShapeDtypeStruct((B, C, HWp), x.dtype),
        grid_spec=pltpu.PrefetchScalarGridSpec(
            num_scalar_prefetch=0,
            grid=grid,
            in_specs=in_specs,
            out_specs=out_spec,
        ),
        compiler_params=cp,
    )(*args)

    if HWp != HW:
        out_flat = out_flat[:, :, :HW]
    return out_flat.reshape(B, C, H, W)


def _reference(x, weight, bias):
    # pure-JAX reference of the PyTorch SpatialAttention forward
    avg = jnp.mean(x, axis=1, keepdims=True)
    mx = jnp.max(x, axis=1, keepdims=True)
    pool = jnp.concatenate([avg, mx], axis=1)                  # (B, 2, H, W)
    conv = jax.lax.conv_general_dilated(
        pool, weight, window_strides=(1, 1),
        padding=((PAD, PAD), (PAD, PAD)),
        dimension_numbers=("NCHW", "OIHW", "NCHW"))
    attn = jax.nn.sigmoid(conv + bias.reshape(1, 1, 1, 1))
    return x * attn


if __name__ == "__main__":
    key = jax.random.PRNGKey(0)
    kx, kw_, kb = jax.random.split(key, 3)

    B, C, H, W = 2, 4, 16, 16
    x = jax.random.normal(kx, (B, C, H, W), dtype=jnp.float32)

    # deterministic conv parameter init (Conv2d(2, 1, 7, padding=3))
    fan_in = 2 * K * K
    bound = 1.0 / (fan_in ** 0.5)
    weight = jax.random.uniform(kw_, (1, 2, K, K), jnp.float32, -bound, bound)
    bias = jax.random.uniform(kb, (1,), jnp.float32, -bound, bound)

    ref = _reference(x, weight, bias)

    # 1) Default (auto -> MXU banded-matmul conv for H*W = 256).
    out = spatial_attention(x, weight, bias)
    out = jax.block_until_ready(out)
    assert out.shape == (B, C, H, W)
    assert jnp.allclose(out, ref, atol=1e-4, rtol=1e-4), float(
        jnp.max(jnp.abs(out - ref)))

    # 2) Shift/mask fallback path (used for large H*W) — same inputs.
    out_s = spatial_attention(x, weight, bias, conv_path="shift")
    out_s = jax.block_until_ready(out_s)
    assert jnp.allclose(out_s, ref, atol=1e-4, rtol=1e-4), float(
        jnp.max(jnp.abs(out_s - ref)))

    # 3) bf16 I/O (f32 internal compute, cast on store).
    x_bf = x.astype(jnp.bfloat16)
    ref_bf = _reference(x_bf.astype(jnp.float32), weight, bias)
    out_bf = spatial_attention(x_bf, weight, bias)
    out_bf = jax.block_until_ready(out_bf)
    assert jnp.allclose(out_bf.astype(jnp.float32), ref_bf,
                        atol=3e-2, rtol=3e-2), float(
        jnp.max(jnp.abs(out_bf.astype(jnp.float32) - ref_bf)))

    print("KERNEL_OK")
</pallas_src>

<mosaic_0001>
module attributes {stable_mosaic.version = 11 : i64} {
  func.func @_spatial_attn_matmul_kernel(%arg0: i32, %arg1: memref<1xf32, #tpu.memory_space<smem>>, %arg2: memref<512x256xf32, #tpu.memory_space<vmem>>, %arg3: memref<2x4x256xf32, #tpu.memory_space<vmem>>, %arg4: memref<2x4x256xf32, #tpu.memory_space<vmem>>) attributes {dimension_semantics = [#tpu.dimension_semantics<parallel>], iteration_bounds = array<i64: 1>, scalar_prefetch = 0 : i64, scratch_operands = 0 : i64, tpu.core_type = #tpu.core_type<tc>, window_params = [{transform_indices = @transform_0, window_bounds = array<i64: 1>}, {pipeline_mode = #tpu.pipeline_mode<synchronous>, transform_indices = @transform_1, window_bounds = array<i64: 512, 256>}, {transform_indices = @transform_2, window_bounds = array<i64: 2, 4, 256>}, {transform_indices = @transform_3, window_bounds = array<i64: 2, 4, 256>}]} {
    %c0 = arith.constant 0 : index
    %c0_0 = arith.constant 0 : index
    %c0_1 = arith.constant 0 : index
    %0 = vector.load %arg3[%c0, %c0_0, %c0_1] : memref<2x4x256xf32, #tpu.memory_space<vmem>>, vector<2x4x256xf32>
    %cst = arith.constant dense<0.000000e+00> : vector<2x256xf32>
    %1 = vector.multi_reduction <add>, %0, %cst [1] : vector<2x4x256xf32> to vector<2x256xf32>
    %cst_2 = arith.constant 4.000000e+00 : f32
    %2 = vector.broadcast %cst_2 : f32 to vector<2x256xf32>
    %3 = arith.divf %1, %2 : vector<2x256xf32>
    %cst_3 = arith.constant dense<0xFF800000> : vector<2x256xf32>
    %4 = vector.multi_reduction <maximumf>, %0, %cst_3 [1] : vector<2x4x256xf32> to vector<2x256xf32>
    %5 = tpu.concatenate %3, %4 in 1 : vector<2x256xf32>, vector<2x256xf32> -> vector<2x512xf32>
    %c0_4 = arith.constant 0 : index
    %c0_5 = arith.constant 0 : index
    %6 = vector.load %arg2[%c0_4, %c0_5] : memref<512x256xf32, #tpu.memory_space<vmem>>, vector<512x256xf32>
    %cst_6 = arith.constant dense<0.000000e+00> : vector<2x256xf32>
    %7 = tpu.matmul %5, %6, %cst_6 {dimension_numbers = #tpu.dot_dimension_numbers<[1], [0], [0], [1], [0, 0, 1, 1], [], []>} : vector<2x512xf32>, vector<512x256xf32>, vector<2x256xf32> -> vector<2x256xf32>
    %c0_7 = arith.constant 0 : index
    %8 = memref.load %arg1[%c0_7] : memref<1xf32, #tpu.memory_space<smem>>
    %9 = vector.broadcast %8 : f32 to vector<2x256xf32>
    %10 = arith.addf %7, %9 : vector<2x256xf32>
    %11 = arith.negf %10 : vector<2x256xf32>
    %12 = math.exp %11 : vector<2x256xf32>
    %cst_8 = arith.constant 1.000000e+00 : f32
    %13 = vector.broadcast %cst_8 : f32 to vector<2x256xf32>
    %14 = arith.addf %13, %12 : vector<2x256xf32>
    %15 = arith.divf %13, %14 : vector<2x256xf32>
    %16 = vector.shape_cast %15 : vector<2x256xf32> to vector<2x1x256xf32>
    %17 = vector.broadcast %16 : vector<2x1x256xf32> to vector<2x4x256xf32>
    %18 = arith.mulf %0, %17 : vector<2x4x256xf32>
    %c0_9 = arith.constant 0 : index
    %c0_10 = arith.constant 0 : index
    %c0_11 = arith.constant 0 : index
    %19 = vector.load %arg4[%c0_9, %c0_10, %c0_11] : memref<2x4x256xf32, #tpu.memory_space<vmem>>, vector<2x4x256xf32>
    tpu.vector_store %arg4[%c0_9, %c0_10, %c0_11], %18 {strides = array<i32>} : memref<2x4x256xf32, #tpu.memory_space<vmem>>, vector<2x4x256xf32>,
    return
  }
  func.func @transform_0(%arg0: i32) -> i32 {
    %c0_i32 = arith.constant 0 : i32
    %c0_i32_0 = arith.constant 0 : i32
    return %c0_i32 : i32
  }
  func.func @transform_1(%arg0: i32) -> (i32, i32) {
    %c0_i32 = arith.constant 0 : i32
    %c0_i32_0 = arith.constant 0 : i32
    %c0_i32_1 = arith.constant 0 : i32
    return %c0_i32, %c0_i32_0 : i32, i32
  }
  func.func @transform_2(%arg0: i32) -> (i32, i32, i32) {
    %c0_i32 = arith.constant 0 : i32
    %c0_i32_0 = arith.constant 0 : i32
    %c0_i32_1 = arith.constant 0 : i32
    return %arg0, %c0_i32, %c0_i32_0 : i32, i32, i32
  }
  func.func @transform_3(%arg0: i32) -> (i32, i32, i32) {
    %c0_i32 = arith.constant 0 : i32
    %c0_i32_0 = arith.constant 0 : i32
    %c0_i32_1 = arith.constant 0 : i32
    return %arg0, %c0_i32, %c0_i32_0 : i32, i32, i32
  }
}

</mosaic_0001>

<bundles_post_ra>
// kernel: tpu_custom_call.1
= control target key start
LH: loop header
LB: loop body
LE: loop exit
PB: predicated region body
PF: predicated region fallthrough
CT: control target
= control target key end

     0   :  { %9 = vsyncpa [#allocation4], 0  ;;  %s710_s0 = inlined_call_operand.<no memory space> [shape: f32[1], index: 0, kind: input, shape index: {}]   ;;  %s711_s1 = inlined_call_operand.hbm [shape: f32[512,256], index: 1, kind: input, shape index: {}]   ;;  %s712_s2 = inlined_call_operand.hbm [shape: f32[2,4,256], index: 2, kind: input, shape index: {}]   ;;  %s713_s3 = inlined_call_operand.hbm [shape: f32[2,4,256], index: 3, kind: output, shape index: {}]  }
   0x1   :  { %10 = vsyncpa [#allocation7], 0 }
   0x2   :  { %11 = vsyncpa [#allocation5], 0  ;;  %s18_s14 = sshll.u32 %s711_s1, 4  ;;  %s626_s15 = smov [#allocation3]   ;;  %s19_s14 = int_to_ptr.hbm [resolvable:$true] %s18_s14 }
   0x3   :  { %s20_s16 = sshll.u32 %s626_s15, 4  ;;  %s31_s19 = sshll.u32 %s712_s2, 4  ;;  %s21_s16 = int_to_ptr.vmem [resolvable:$true] %s20_s16  ;;  %s32_s19 = int_to_ptr.hbm [resolvable:$true] %s31_s19 }
   0x4   :  { %s627_s20 = smov 256   ;;  %s628_s21 = smov 16  }
   0x5   :  { %26 = dma.hbm_to_vmem [thread:$0]  %s19_s14, 16384, %s21_s16, [#allocation4], %s627_s20, %s627_s20, %s628_s21  }
   0x6   :  { %s629_s22 = smov [#allocation6]   ;;  %s630_s24 = smov 128  }
   0x7   :  { %s33_s23 = sshll.u32 %s629_s22, 4  ;;  %s631_s25 = smov 8   ;;  %s34_s23 = int_to_ptr.vmem [resolvable:$true] %s33_s23 }
   0x8   :  { %39 = dma.hbm_to_vmem [thread:$0]  %s32_s19, 256, %s34_s23, [#allocation7], %s630_s24, %s630_s24, %s631_s25  }
   0x9   :  { %620 = dma.done.wait [#allocation4], 16384  }
   0xa   :  { %621 = vsyncadd [#allocation4], 4294950912 }
   0xb   :  { %622 = dma.done.wait [#allocation7], 256  }
   0xc   :  { %623 = vsyncadd [#allocation7], 4294967040  ;;  %v253_v0 = vld [vmem:[#allocation3 + $0x2f0] sm:$0xff]  ;;  %v251_v2 = vld [vmem:[#allocation3 + $0x2e0] sm:$0xff]  ;;  %v632_v46 = vmov 4.0   ;;  %vm63_vm0 = vcmask 1043456  }
   0xd   :  { %v189_v1 = vld [vmem:[#allocation3 + $0xf0] sm:$0xff]  ;;  %329 = vmatpush.msra.mxu2 %v253_v0  ;;  %v187_v4 = vld [vmem:[#allocation3 + $0xe0] sm:$0xff]  ;;  %538 = vrcp.f32 %v632_v46  ;;  %v667_v63 = vld [vmem:[#allocation6 + $0x8] sm:$0xff]  ;;  %vm146_vm1 = vcmask 1041409   ;;  %vm490_vm11 = vcmask 1040384   ;;  %s514_s29 = sshll.u32 %s713_s3, 4  ;;  %s515_s29 = int_to_ptr.hbm [resolvable:$true] %s514_s29 }
   0xe   :  { %289 = vmatpush.msra.mxu0 %v189_v1  ;;  %v285_v3 = vld [vmem:[#allocation3 + $0x3f0] sm:$0xff]  ;;  %v283_v7 = vld [vmem:[#allocation3 + $0x3e0] sm:$0xff]  ;;  %56 = vst [vmem:[#allocation1 + $0x10] ss:$2 sm:$0xff] %v667_v63 }
   0xf   :  { %v221_v5 = vld [vmem:[#allocation3 + $0x1f0] sm:$0xff]  ;;  %349 = vmatpush.msra.mxu3 %v285_v3  ;;  %330 = vmatpush.msra.mxu2 %v251_v2  ;;  %v219_v9 = vld [vmem:[#allocation3 + $0x1e0] sm:$0xff]  ;;  %v254_v2 = vld [vmem:[#allocation3 + $0x2f8] sm:$0xff] }
  0x10   :  { %309 = vmatpush.msra.mxu1 %v221_v5  ;;  %v249_v6 = vld [vmem:[#allocation3 + $0x2d0] sm:$0xff]  ;;  %290 = vmatpush.msra.mxu0 %v187_v4  ;;  %v247_v11 = vld [vmem:[#allocation3 + $0x2c0] sm:$0xff]  ;;  %v190_v5 = vld [vmem:[#allocation3 + $0xf8] sm:$0xff] }
  0x11   :  { %v185_v8 = vld [vmem:[#allocation3 + $0xd0] sm:$0xff]  ;;  %350 = vmatpush.msra.mxu3 %v283_v7  ;;  %v183_v12 = vld [vmem:[#allocation3 + $0xc0] sm:$0xff]  ;;  %331 = vmatpush.msra.mxu2 %v249_v6  ;;  %v252_v6 = vld [vmem:[#allocation3 + $0x2e8] sm:$0xff] }
  0x12   :  { %v281_v10 = vld [vmem:[#allocation3 + $0x3d0] sm:$0xff]  ;;  %310 = vmatpush.msra.mxu1 %v219_v9  ;;  %291 = vmatpush.msra.mxu0 %v185_v8  ;;  %v279_v14 = vld [vmem:[#allocation3 + $0x3c0] sm:$0xff]  ;;  %v286_v7 = vld [vmem:[#allocation3 + $0x3f8] sm:$0xff] }
  0x13   :  { %v217_v13 = vld [vmem:[#allocation3 + $0x1d0] sm:$0xff]  ;;  %v215_v15 = vld [vmem:[#allocation3 + $0x1c0] sm:$0xff]  ;;  %351 = vmatpush.msra.mxu3 %v281_v10  ;;  %332 = vmatpush.msra.mxu2 %v247_v11  ;;  %v663_v57 = vpop.eup %538  ;;  %v188_v9 = vld [vmem:[#allocation3 + $0xe8] sm:$0xff] }
  0x14   :  { %311 = vmatpush.msra.mxu1 %v217_v13  ;;  %v245_v16 = vld [vmem:[#allocation3 + $0x2b0] sm:$0xff]  ;;  %292 = vmatpush.msra.mxu0 %v183_v12  ;;  %v243_v20 = vld [vmem:[#allocation3 + $0x2a0] sm:$0xff]  ;;  %v93_v4 = vmul.f32 4.0, %v663_v57  ;;  %v222_v10 = vld [vmem:[#allocation3 + $0x1f8] sm:$0xff]  ;;  %vm97_vm2 = vweird.f32 %v663_v57 }
  0x15   :  { %v181_v17 = vld [vmem:[#allocation3 + $0xb0] sm:$0xff]  ;;  %352 = vmatpush.msra.mxu3 %v279_v14  ;;  %v179_v21 = vld [vmem:[#allocation3 + $0xa0] sm:$0xff]  ;;  %333 = vmatpush.msra.mxu2 %v245_v16  ;;  %v250_v11 = vld [vmem:[#allocation3 + $0x2d8] sm:$0xff] }
  0x16   :  { %v277_v18 = vld [vmem:[#allocation3 + $0x3b0] sm:$0xff]  ;;  %312 = vmatpush.msra.mxu1 %v215_v15  ;;  %293 = vmatpush.msra.mxu0 %v181_v17  ;;  %v275_v22 = vld [vmem:[#allocation3 + $0x3a0] sm:$0xff]  ;;  %v284_v12 = vld [vmem:[#allocation3 + $0x3e8] sm:$0xff]  ;;  %v94_v17 = vsub.f32 1.0, %v93_v4 }
  0x17   :  { %v213_v19 = vld [vmem:[#allocation3 + $0x1b0] sm:$0xff]  ;;  %v211_v23 = vld [vmem:[#allocation3 + $0x1a0] sm:$0xff]  ;;  %353 = vmatpush.msra.mxu3 %v277_v18  ;;  %334 = vmatpush.msra.mxu2 %v243_v20  ;;  %v186_v13 = vld [vmem:[#allocation3 + $0xd8] sm:$0xff] }
  0x18   :  { %313 = vmatpush.msra.mxu1 %v213_v19  ;;  %v241_v24 = vld [vmem:[#allocation3 + $0x290] sm:$0xff]  ;;  %294 = vmatpush.msra.mxu0 %v179_v21  ;;  %v239_v28 = vld [vmem:[#allocation3 + $0x280] sm:$0xff]  ;;  %v220_v14 = vld [vmem:[#allocation3 + $0x1e8] sm:$0xff] }
  0x19   :  { %v177_v25 = vld [vmem:[#allocation3 + $0x90] sm:$0xff]  ;;  %354 = vmatpush.msra.mxu3 %v275_v22  ;;  %v175_v29 = vld [vmem:[#allocation3 + $0x80] sm:$0xff]  ;;  %335 = vmatpush.msra.mxu2 %v241_v24  ;;  %v248_v15 = vld [vmem:[#allocation3 + $0x2c8] sm:$0xff] }
  0x1a   :  { %v273_v26 = vld [vmem:[#allocation3 + $0x390] sm:$0xff]  ;;  %314 = vmatpush.msra.mxu1 %v211_v23  ;;  %295 = vmatpush.msra.mxu0 %v177_v25  ;;  %v271_v30 = vld [vmem:[#allocation3 + $0x380] sm:$0xff]  ;;  %v282_v16 = vld [vmem:[#allocation3 + $0x3d8] sm:$0xff] }
  0x1b   :  { %v209_v27 = vld [vmem:[#allocation3 + $0x190] sm:$0xff]  ;;  %v207_v31 = vld [vmem:[#allocation3 + $0x180] sm:$0xff]  ;;  %355 = vmatpush.msra.mxu3 %v273_v26  ;;  %336 = vmatpush.msra.mxu2 %v239_v28  ;;  %v184_v18 = vld [vmem:[#allocation3 + $0xc8] sm:$0xff] }
  0x1c   :  { %315 = vmatpush.msra.mxu1 %v209_v27  ;;  %v237_v32 = vld [vmem:[#allocation3 + $0x270] sm:$0xff]  ;;  %296 = vmatpush.msra.mxu0 %v175_v29  ;;  %v235_v36 = vld [vmem:[#allocation3 + $0x260] sm:$0xff]  ;;  %v218_v19 = vld [vmem:[#allocation3 + $0x1d8] sm:$0xff] }
  0x1d   :  { %v173_v33 = vld [vmem:[#allocation3 + $0x70] sm:$0xff]  ;;  %356 = vmatpush.msra.mxu3 %v271_v30  ;;  %v171_v37 = vld [vmem:[#allocation3 + $0x60] sm:$0xff]  ;;  %337 = vmatpush.msra.mxu2 %v237_v32  ;;  %v246_v22 = vld [vmem:[#allocation3 + $0x2b8] sm:$0xff] }
  0x1e   :  { %v269_v34 = vld [vmem:[#allocation3 + $0x370] sm:$0xff]  ;;  %316 = vmatpush.msra.mxu1 %v207_v31  ;;  %297 = vmatpush.msra.mxu0 %v173_v33  ;;  %v267_v38 = vld [vmem:[#allocation3 + $0x360] sm:$0xff]  ;;  %v280_v23 = vld [vmem:[#allocation3 + $0x3c8] sm:$0xff] }
  0x1f   :  { %v205_v35 = vld [vmem:[#allocation3 + $0x170] sm:$0xff]  ;;  %v203_v39 = vld [vmem:[#allocation3 + $0x160] sm:$0xff]  ;;  %357 = vmatpush.msra.mxu3 %v269_v34  ;;  %338 = vmatpush.msra.mxu2 %v235_v36  ;;  %v57_v24 = vld.sshfl [vmem:[#allocation1 + $0x10] sm:$0xff pattern:$0x75316420]  ;;  %v95_v36 = vmul.f32 %v663_v57, %v94_v17 }
  0x20   :  { %317 = vmatpush.msra.mxu1 %v205_v35  ;;  %v233_v40 = vld [vmem:[#allocation3 + $0x250] sm:$0xff]  ;;  %298 = vmatpush.msra.mxu0 %v171_v37  ;;  %v231_v44 = vld [vmem:[#allocation3 + $0x240] sm:$0xff]  ;;  %v78_v27 = vsel %vm63_vm0, %v57_v24, 0.0  ;;  %v182_v34 = vld [vmem:[#allocation3 + $0xb8] sm:$0xff] }
  0x21   :  { %v169_v41 = vld [vmem:[#allocation3 + $0x50] sm:$0xff]  ;;  %358 = vmatpush.msra.mxu3 %v267_v38  ;;  %v167_v45 = vld [vmem:[#allocation3 + $0x40] sm:$0xff]  ;;  %339 = vmatpush.msra.mxu2 %v233_v40  ;;  %v79_v31 = vrot.slane %v78_v27, 4  ;;  %v216_v35 = vld [vmem:[#allocation3 + $0x1c8] sm:$0xff] }
  0x22   :  { %v265_v42 = vld [vmem:[#allocation3 + $0x350] sm:$0xff]  ;;  %318 = vmatpush.msra.mxu1 %v203_v39  ;;  %299 = vmatpush.msra.mxu0 %v169_v41  ;;  %v263_v47 = vld [vmem:[#allocation3 + $0x340] sm:$0xff]  ;;  %v244_v37 = vld [vmem:[#allocation3 + $0x2a8] sm:$0xff] }
  0x23   :  { %v201_v43 = vld [vmem:[#allocation3 + $0x150] sm:$0xff]  ;;  %v199_v48 = vld [vmem:[#allocation3 + $0x140] sm:$0xff]  ;;  %359 = vmatpush.msra.mxu3 %v265_v42  ;;  %340 = vmatpush.msra.mxu2 %v231_v44  ;;  %v278_v38 = vld [vmem:[#allocation3 + $0x3b8] sm:$0xff]  ;;  %v80_v40 = vadd.f32 %v79_v31, %v78_v27 }
  0x24   :  { %319 = vmatpush.msra.mxu1 %v201_v43  ;;  %v229_v49 = vld [vmem:[#allocation3 + $0x230] sm:$0xff]  ;;  %300 = vmatpush.msra.mxu0 %v167_v45  ;;  %v227_v53 = vld [vmem:[#allocation3 + $0x220] sm:$0xff]  ;;  %v180_v41 = vld [vmem:[#allocation3 + $0xa8] sm:$0xff] }
  0x25   :  { %v165_v50 = vld [vmem:[#allocation3 + $0x30] sm:$0xff]  ;;  %360 = vmatpush.msra.mxu3 %v263_v47  ;;  %v163_v54 = vld [vmem:[#allocation3 + $0x20] sm:$0xff]  ;;  %341 = vmatpush.msra.mxu2 %v229_v49  ;;  %v214_v43 = vld [vmem:[#allocation3 + $0x1b8] sm:$0xff] }
  0x26   :  { %v261_v51 = vld [vmem:[#allocation3 + $0x330] sm:$0xff]  ;;  %320 = vmatpush.msra.mxu1 %v199_v48  ;;  %301 = vmatpush.msra.mxu0 %v165_v50  ;;  %v259_v55 = vld [vmem:[#allocation3 + $0x320] sm:$0xff]  ;;  %v242_v44 = vld [vmem:[#allocation3 + $0x298] sm:$0xff]  ;;  %v81_v48 = vrot.slane %v80_v40, 2 }
  0x27   :  { %v197_v52 = vld [vmem:[#allocation3 + $0x130] sm:$0xff]  ;;  %v195_v56 = vld [vmem:[#allocation3 + $0x120] sm:$0xff]  ;;  %361 = vmatpush.msra.mxu3 %v261_v51  ;;  %342 = vmatpush.msra.mxu2 %v227_v53  ;;  %v276_v45 = vld [vmem:[#allocation3 + $0x3a8] sm:$0xff]  ;;  %v96_v53 = vadd.f32 %v663_v57, %v95_v36 }
  0x28   :  { %321 = vmatpush.msra.mxu1 %v197_v52  ;;  %v225_v58 = vld [vmem:[#allocation3 + $0x210] sm:$0xff]  ;;  %v665_v60 = vld [vmem:[#allocation6] sm:$0xff]  ;;  %302 = vmatpush.msra.mxu0 %v163_v54  ;;  %v178_v50 = vld [vmem:[#allocation3 + $0x98] sm:$0xff] }
  0x29   :  { %v161_v59 = vld [vmem:[#allocation3 + $0x10] sm:$0xff]  ;;  %52 = vst [vmem:[#allocation1] ss:$2 sm:$0xff] %v665_v60  ;;  %362 = vmatpush.msra.mxu3 %v259_v55  ;;  %v223_v0 = vld [vmem:[#allocation3 + $0x200] sm:$0xff]  ;;  %343 = vmatpush.msra.mxu2 %v225_v58  ;;  %v212_v51 = vld [vmem:[#allocation3 + $0x1a8] sm:$0xff] }
  0x2a   :  { %v257_v61 = vld [vmem:[#allocation3 + $0x310] sm:$0xff]  ;;  %322 = vmatpush.msra.mxu1 %v195_v56  ;;  %v159_v1 = vld [vmem:[#allocation3] sm:$0xff]  ;;  %303 = vmatpush.msra.mxu0 %v161_v59  ;;  %v240_v52 = vld [vmem:[#allocation3 + $0x288] sm:$0xff] }
  0x2b   :  { %v193_v62 = vld [vmem:[#allocation3 + $0x110] sm:$0xff]  ;;  %v255_v3 = vld [vmem:[#allocation3 + $0x300] sm:$0xff]  ;;  %363 = vmatpush.msra.mxu3 %v257_v61  ;;  %344 = vmatpush.msra.mxu2 %v223_v0  ;;  %v274_v55 = vld [vmem:[#allocation3 + $0x398] sm:$0xff] }
  0x2c   :  { %323 = vmatpush.msra.mxu1 %v193_v62  ;;  %304 = vmatpush.msra.mxu0 %v159_v1  ;;  %v191_v8 = vld [vmem:[#allocation3 + $0x100] sm:$0xff]  ;;  %v58_v25 = vld.sshfl [vmem:[#allocation1 + $0x18] sm:$0xff pattern:$0x75316420]  ;;  %v176_v56 = vld [vmem:[#allocation3 + $0x88] sm:$0xff]  ;;  %v82_v62 = vadd.f32 %v81_v48, %v80_v40 }
  0x2d   :  { %409 = vmatpush.msrb.mxu2 %v254_v2  ;;  %364 = vmatpush.msra.mxu3 %v255_v3  ;;  %v85_v29 = vsel %vm63_vm0, %v58_v25, 0.0  ;;  %107 = vst [vmem:[#allocation1 + $0x10] ss:$2 sm:$0xff] %v667_v63  ;;  %v210_v58 = vld [vmem:[#allocation3 + $0x198] sm:$0xff] }
  0x2e   :  { %369 = vmatpush.msrb.mxu0 %v190_v5  ;;  %324 = vmatpush.msra.mxu1 %v191_v8  ;;  %v86_v33 = vrot.slane %v85_v29, 4  ;;  %v238_v2 = vld [vmem:[#allocation3 + $0x278] sm:$0xff] }
  0x2f   :  { %429 = vmatpush.msrb.mxu3 %v286_v7  ;;  %410 = vmatpush.msrb.mxu2 %v252_v6  ;;  %v272_v7 = vld [vmem:[#allocation3 + $0x388] sm:$0xff]  ;;  %v270_v24 = vld [vmem:[#allocation3 + $0x378] sm:$0xff] }
  0x30   :  { %v53_v20 = vld.sshfl [vmem:[#allocation1] sm:$0xff pattern:$0x75316420]  ;;  %v54_v21 = vld.sshfl [vmem:[#allocation1 + $0x8] sm:$0xff pattern:$0x75316420]  ;;  %370 = vmatpush.msrb.mxu0 %v188_v9  ;;  %389 = vmatpush.msrb.mxu1 %v222_v10  ;;  %v87_v46 = vadd.f32 %v86_v33, %v85_v29 }
  0x31   :  { %411 = vmatpush.msrb.mxu2 %v250_v11  ;;  %430 = vmatpush.msrb.mxu3 %v284_v12  ;;  %103 = vst [vmem:[#allocation1] ss:$2 sm:$0xff] %v665_v60  ;;  %v64_v26 = vsel %vm63_vm0, %v53_v20, 0.0  ;;  %v71_v28 = vsel %vm63_vm0, %v54_v21, 0.0  ;;  %v83_v11 = vrot.slane %v82_v62, 1  ;;  %v174_v12 = vld [vmem:[#allocation3 + $0x78] sm:$0xff] }
  0x32   :  { %371 = vmatpush.msrb.mxu0 %v186_v13  ;;  %390 = vmatpush.msrb.mxu1 %v220_v14  ;;  %v65_v30 = vrot.slane %v64_v26, 4  ;;  %v72_v32 = vrot.slane %v71_v28, 4  ;;  %v88_v54 = vrot.slane %v87_v46, 2  ;;  %v208_v13 = vld [vmem:[#allocation3 + $0x188] sm:$0xff]  ;;  %v206_v29 = vld [vmem:[#allocation3 + $0x178] sm:$0xff] }
  0x33   :  { %412 = vmatpush.msrb.mxu2 %v248_v15  ;;  %431 = vmatpush.msrb.mxu3 %v282_v16  ;;  %v98_v15 = vsel %vm97_vm2, %v663_v57, %v96_v53  ;;  %v84_v21 = vadd.f32 %v83_v11, %v82_v62  ;;  %v172_v57 = vld [vmem:[#allocation3 + $0x68] sm:$0xff]  ;;  %v170_v40 = vld [vmem:[#allocation3 + $0x58] sm:$0xff] }
  0x34   :  { %372 = vmatpush.msrb.mxu0 %v184_v18  ;;  %391 = vmatpush.msrb.mxu1 %v218_v19  ;;  %v66_v39 = vadd.f32 %v65_v30, %v64_v26  ;;  %v73_v42 = vadd.f32 %v72_v32, %v71_v28  ;;  %v108_v3 = vld.sshfl [vmem:[#allocation1 + $0x10] sm:$0xff pattern:$0x75316420]  ;;  %v89_v6 = vadd.f32 %v88_v54, %v87_v46  ;;  %v109_v16 = vld.sshfl [vmem:[#allocation1 + $0x18] sm:$0xff pattern:$0x75316420] }
  0x35   :  { %413 = vmatpush.msrb.mxu2 %v246_v22  ;;  %432 = vmatpush.msrb.mxu3 %v280_v23  ;;  %v128_v9 = vsel %vm63_vm0, %v108_v3, -inf  ;;  %v135_v22 = vsel %vm63_vm0, %v109_v16, -inf  ;;  %v236_v23 = vld [vmem:[#allocation3 + $0x268] sm:$0xff]  ;;  %v101_v32 = vmul.f32 %v98_v15, %v84_v21  ;;  %v230_v53 = vld [vmem:[#allocation3 + $0x238] sm:$0xff] }
  0x36   :  { %373 = vmatpush.msrb.mxu0 %v182_v34  ;;  %392 = vmatpush.msrb.mxu1 %v216_v35  ;;  %v67_v47 = vrot.slane %v66_v39, 2  ;;  %v74_v49 = vrot.slane %v73_v42, 2  ;;  %v129_v14 = vrot.slane %v128_v9, 4  ;;  %v136_v27 = vrot.slane %v135_v22, 4  ;;  %v234_v34 = vld [vmem:[#allocation3 + $0x258] sm:$0xff]  ;;  %v224_v16 = vld [vmem:[#allocation3 + $0x208] sm:$0xff] }
  0x37   :  { %414 = vmatpush.msrb.mxu2 %v244_v37  ;;  %433 = vmatpush.msrb.mxu3 %v278_v38  ;;  %v90_v33 = vrot.slane %v89_v6, 1  ;;  %v226_v11 = vld [vmem:[#allocation3 + $0x218] sm:$0xff]  ;;  %v192_v21 = vld [vmem:[#allocation3 + $0x108] sm:$0xff] }
  0x38   :  { %v104_v59 = vld.sshfl [vmem:[#allocation1] sm:$0xff pattern:$0x75316420]  ;;  %v68_v61 = vadd.f32 %v67_v47, %v66_v39  ;;  %v105_v0 = vld.sshfl [vmem:[#allocation1 + $0x8] sm:$0xff pattern:$0x75316420]  ;;  %374 = vmatpush.msrb.mxu0 %v180_v41  ;;  %393 = vmatpush.msrb.mxu1 %v214_v43  ;;  %v75_v1 = vadd.f32 %v74_v49, %v73_v42  ;;  %v130_v25 = vmax.f32 %v128_v9, %v129_v14 }
  0x39   :  { %v114_v4 = vsel %vm63_vm0, %v104_v59, -inf  ;;  %v121_v5 = vsel %vm63_vm0, %v105_v0, -inf  ;;  %415 = vmatpush.msrb.mxu2 %v242_v44  ;;  %434 = vmatpush.msrb.mxu3 %v276_v45  ;;  %v137_v37 = vmax.f32 %v135_v22, %v136_v27  ;;  %v268_v39 = vld [vmem:[#allocation3 + $0x368] sm:$0xff]  ;;  %v91_v43 = vadd.f32 %v90_v33, %v89_v6  ;;  %v266_v49 = vld [vmem:[#allocation3 + $0x358] sm:$0xff] }
  0x3a   :  { %v115_v8 = vrot.slane %v114_v4, 4  ;;  %v69_v10 = vrot.slane %v68_v61, 1  ;;  %375 = vmatpush.msrb.mxu0 %v178_v50  ;;  %394 = vmatpush.msrb.mxu1 %v212_v51  ;;  %v122_v17 = vrot.slane %v121_v5, 4  ;;  %v76_v18 = vrot.slane %v75_v1, 1  ;;  %v204_v44 = vld [vmem:[#allocation3 + $0x168] sm:$0xff]  ;;  %v166_v0 = vld [vmem:[#allocation3 + $0x38] sm:$0xff] }
  0x3b   :  { %416 = vmatpush.msrb.mxu2 %v240_v52  ;;  %435 = vmatpush.msrb.mxu3 %v274_v55  ;;  %v131_v35 = vrot.slane %v130_v25, 2  ;;  %v232_v45 = vld [vmem:[#allocation3 + $0x248] sm:$0xff]  ;;  %v138_v48 = vrot.slane %v137_v37, 2  ;;  %v102_v52 = vmul.f32 %v98_v15, %v91_v43  ;;  %v262_v6 = vld [vmem:[#allocation3 + $0x338] sm:$0xff]  ;;  %v288_v22 = vstv %s710_s0  ;;  %s633_s0 = smov [#allocation8]  }
  0x3c   :  { %v116_v19 = vmax.f32 %v114_v4, %v115_v8  ;;  %v70_v20 = vadd.f32 %v69_v10, %v68_v61  ;;  %376 = vmatpush.msrb.mxu0 %v176_v56  ;;  %395 = vmatpush.msrb.mxu1 %v210_v58  ;;  %v123_v26 = vmax.f32 %v121_v5, %v122_v17  ;;  %v168_v50 = vld [vmem:[#allocation3 + $0x48] sm:$0xff]  ;;  %v202_v58 = vld [vmem:[#allocation3 + $0x158] sm:$0xff]  ;;  %s512_s26 = sshll.u32 %s633_s0, 4  ;;  %s513_s26 = int_to_ptr.vmem [resolvable:$true] %s512_s26 }
  0x3d   :  { %v77_v28 = vadd.f32 %v76_v18, %v75_v1  ;;  %417 = vmatpush.msrb.mxu2 %v238_v2  ;;  %436 = vmatpush.msrb.mxu3 %v272_v7  ;;  %v132_v46 = vmax.f32 %v130_v25, %v131_v35  ;;  %v139_v56 = vmax.f32 %v137_v37, %v138_v48  ;;  %v264_v59 = vld [vmem:[#allocation3 + $0x348] sm:$0xff]  ;;  %v198_v10 = vld [vmem:[#allocation3 + $0x138] sm:$0xff] }
  0x3e   :  { %v117_v30 = vrot.slane %v116_v19, 2  ;;  %v99_v31 = vmul.f32 %v98_v15, %v70_v20  ;;  %377 = vmatpush.msrb.mxu0 %v174_v12  ;;  %396 = vmatpush.msrb.mxu1 %v208_v13  ;;  %v124_v36 = vrot.slane %v123_v26, 2  ;;  %v228_v1 = vld [vmem:[#allocation3 + $0x228] sm:$0xff]  ;;  %v162_v14 = vld [vmem:[#allocation3 + $0x18] sm:$0xff] }
  0x3f   :  { %v100_v38 = vmul.f32 %v98_v15, %v77_v28  ;;  %418 = vmatpush.msrb.mxu2 %v236_v23  ;;  %437 = vmatpush.msrb.mxu3 %v270_v24  ;;  %v133_v54 = vrot.slane %v132_v46, 1  ;;  %v140_v4 = vrot.slane %v139_v56, 1  ;;  %v200_v5 = vld [vmem:[#allocation3 + $0x148] sm:$0xff]  ;;  %v258_v17 = vld [vmem:[#allocation3 + $0x318] sm:$0xff] }
  0x40   :  { %v118_v41 = vmax.f32 %v116_v19, %v117_v30  ;;  %v689_v42 = vsel %vm146_vm1, %v101_v32, %v99_v31  ;;  %378 = vmatpush.msrb.mxu0 %v172_v57  ;;  %397 = vmatpush.msrb.mxu1 %v206_v29  ;;  %v125_v47 = vmax.f32 %v123_v26, %v124_v36  ;;  %v164_v7 = vld [vmem:[#allocation3 + $0x28] sm:$0xff]  ;;  %v194_v19 = vld [vmem:[#allocation3 + $0x118] sm:$0xff] }
  0x41   :  { %305 = vmatmul.f32.vlgmr.msra.gmra.mxu0 %v689_v42  ;;  %419 = vmatpush.msrb.mxu2 %v234_v34  ;;  %v148_v62 = vsel %vm146_vm1, %v102_v52, %v100_v38  ;;  %v134_v2 = vmax.f32 %v132_v46, %v133_v54  ;;  %v141_v9 = vmax.f32 %v139_v56, %v140_v4  ;;  %v260_v12 = vld [vmem:[#allocation3 + $0x328] sm:$0xff] }
  0x42   :  { %v119_v51 = vrot.slane %v118_v41, 1  ;;  %438 = vmatpush.msrb.mxu3 %v268_v39  ;;  %379 = vmatpush.msrb.mxu0 %v170_v40  ;;  %v126_v55 = vrot.slane %v125_v47, 1  ;;  %v196_v15 = vld [vmem:[#allocation3 + $0x128] sm:$0xff] }
  0x43   :  { %398 = vmatpush.msrb.mxu1 %v204_v44  ;;  %420 = vmatpush.msrb.mxu2 %v232_v45  ;;  %v160_v18 = vld [vmem:[#allocation3 + $0x8] sm:$0xff] }
  0x44   :  { %v120_v61 = vmax.f32 %v118_v41, %v119_v51  ;;  %439 = vmatpush.msrb.mxu3 %v266_v49  ;;  %380 = vmatpush.msrb.mxu0 %v168_v50  ;;  %v127_v3 = vmax.f32 %v125_v47, %v126_v55  ;;  %v256_v20 = vld [vmem:[#allocation3 + $0x308] sm:$0xff] }
  0x45   :  { %325 = vmatmul.f32.vlgmr.msra.gmra.mxu1 %v148_v62  ;;  %421 = vmatpush.msrb.mxu2 %v230_v53 }
  0x46   :  { %399 = vmatpush.msrb.mxu1 %v202_v58  ;;  %440 = vmatpush.msrb.mxu3 %v264_v59  ;;  %v155_v8 = vsel %vm146_vm1, %v134_v2, %v120_v61  ;;  %v156_v13 = vsel %vm146_vm1, %v141_v9, %v127_v3 }
  0x47   :  { %381 = vmatpush.msrb.mxu0 %v166_v0  ;;  %422 = vmatpush.msrb.mxu2 %v228_v1 }
  0x48   :  { %345 = vmatmul.f32.vlgmr.msra.gmra.mxu2 %v155_v8  ;;  %400 = vmatpush.msrb.mxu1 %v200_v5 }
  0x49   :  { %441 = vmatpush.msrb.mxu3 %v262_v6  ;;  %382 = vmatpush.msrb.mxu0 %v164_v7 }
  0x4a   :  { %365 = vmatmul.f32.vlgmr.msra.gmra.mxu3 %v156_v13  ;;  %401 = vmatpush.msrb.mxu1 %v198_v10 }
  0x4b   :  { %423 = vmatpush.msrb.mxu2 %v226_v11  ;;  %442 = vmatpush.msrb.mxu3 %v260_v12 }
  0x4c   :  { %383 = vmatpush.msrb.mxu0 %v162_v14  ;;  %402 = vmatpush.msrb.mxu1 %v196_v15 }
  0x4d   :  { %424 = vmatpush.msrb.mxu2 %v224_v16  ;;  %443 = vmatpush.msrb.mxu3 %v258_v17 }
  0x4e   :  { %384 = vmatpush.msrb.mxu0 %v160_v18  ;;  %403 = vmatpush.msrb.mxu1 %v194_v19 }
  0x4f   :  { %444 = vmatpush.msrb.mxu3 %v256_v20  ;;  %385 = vmatmul.f32.vlgmr.msrb.gmra.mxu0 %v689_v42 }
  0x50   :  { %425 = vmatmul.f32.vlgmr.msrb.gmra.mxu2 %v155_v8  ;;  %404 = vmatpush.msrb.mxu1 %v192_v21 }
  0x51   :  { %405 = vmatmul.f32.vlgmr.msrb.gmra.mxu1 %v148_v62 }
  0x52   :  { %445 = vmatmul.f32.vlgmr.msrb.gmra.mxu3 %v156_v13 }
  0xbe   :  { %v306_v23 = vpop.f32.mrf.mxu0 }
  0xbf   :  { %v307_v24 = vadd.f32 %v306_v23, %v288_v22 }
  0xc2   :  { %v326_v25 = vpop.f32.mrf.mxu1 }
  0xc3   :  { %v327_v26 = vadd.f32 %v326_v25, %v307_v24 }
  0xcb   :  { %v346_v27 = vpop.f32.mrf.mxu2 }
  0xcc   :  { %v347_v28 = vadd.f32 %v346_v27, %v327_v26  ;;  %v386_v57 = vpop.f32.mrf.mxu0 }
  0xcd   :  { %v366_v29 = vpop.f32.mrf.mxu3  ;;  %v387_v30 = vadd.f32 %v386_v57, %v288_v22 }
  0xce   :  { %v367_v31 = vadd.f32 %v366_v29, %v347_v28  ;;  %v406_v32 = vpop.f32.mrf.mxu1 }
  0xcf   :  { %v407_v34 = vadd.f32 %v406_v32, %v387_v30 }
  0xd0   :  { %v528_v33 = vmul.f32 -1.442695, %v367_v31 }
  0xd2   :  { %540 = vpow2.f32 %v528_v33 }
  0xd3   :  { %v426_v35 = vpop.f32.mrf.mxu2 }
  0xd4   :  { %v427_v36 = vadd.f32 %v426_v35, %v407_v34 }
  0xd5   :  { %v446_v37 = vpop.f32.mrf.mxu3 }
  0xd6   :  { %v447_v38 = vadd.f32 %v446_v37, %v427_v36 }
  0xd8   :  { %v541_v39 = vpop.eup %540  ;;  %v529_v40 = vmul.f32 -1.442695, %v447_v38 }
  0xd9   :  { %v455_v41 = vadd.f32 1.0, %v541_v39 }
  0xda   :  { %542 = vpow2.f32 %v529_v40 }
  0xdb   :  { %544 = vrcp.f32 %v455_v41  ;;  %vm462_vm3 = vweird.f32 %v455_v41  ;;  %v466_v51 = vand.u32 2147483647, %v455_v41  ;;  %v468_v52 = vand.u32 2147483648, %v455_v41 }
  0xdd   :  { %v469_v59 = vor.u32 1.1754944e-38, %v468_v52  ;;  %vm467_vm9 = vcmp.eq.f32.partialorder %v466_v51, 8.507059e+37 }
  0xe0   :  { %v543_v42 = vpop.eup %542 }
  0xe1   :  { %v545_v43 = vpop.eup %544  ;;  %v456_v44 = vadd.f32 1.0, %v543_v42 }
  0xe2   :  { %v458_v45 = vmul.f32 %v545_v43, %v455_v41  ;;  %vm463_vm4 = vweird.f32 %v545_v43 }
  0xe3   :  { %546 = vrcp.f32 %v456_v44  ;;  %v483_v53 = vand.u32 2147483648, %v456_v44  ;;  %v481_v56 = vand.u32 2147483647, %v456_v44  ;;  %vm464_vm6 = vmor %vm462_vm3, %vm463_vm4  ;;  %vm477_vm7 = vweird.f32 %v456_v44 }
  0xe4   :  { %v459_v46 = vsub.f32 1.0, %v458_v45 }
  0xe5   :  { %v484_v61 = vor.u32 1.1754944e-38, %v483_v53  ;;  %vm482_vm10 = vcmp.eq.f32.partialorder %v481_v56, 8.507059e+37 }
  0xe6   :  { %v460_v48 = vmul.f32 %v545_v43, %v459_v46 }
  0xe8   :  { %v461_v54 = vadd.f32 %v545_v43, %v460_v48 }
  0xe9   :  { %v547_v47 = vpop.eup %546 }
  0xea   :  { %v473_v49 = vmul.f32 %v547_v47, %v456_v44  ;;  %vm478_vm5 = vweird.f32 %v547_v47  ;;  %v465_v0 = vsel %vm464_vm6, %v545_v43, %v461_v54 }
  0xeb   :  { %vm479_vm8 = vmor %vm477_vm7, %vm478_vm5  ;;  %v470_v3 = vsel %vm467_vm9, %v469_v59, %v465_v0 }
  0xec   :  { %v474_v50 = vsub.f32 1.0, %v473_v49 }
  0xee   :  { %v475_v55 = vmul.f32 %v547_v47, %v474_v50 }
  0xf0   :  { %v476_v58 = vadd.f32 %v547_v47, %v475_v55 }
  0xf2   :  { %v480_v62 = vsel %vm479_vm8, %v547_v47, %v476_v58 }
  0xf3   :  { %v485_v1 = vsel %vm482_vm10, %v484_v61, %v480_v62 }
  0xf4   :  { %v489_v2 = vrot.slane %v485_v1, 7 }
  0xf6   :  { %v491_v4 = vsel %vm490_vm11, %v470_v3, %v489_v2  ;;  %v492_v5 = vsel %vm146_vm1, %v470_v3, %v489_v2 }
  0xf7   :  { %v493_v6 = vrot.slane %v492_v5, 1  ;;  %v495_v7 = vperm.slane %v491_v4, 1  ;;  %v494_v8 = vperm.slane %v491_v4, 0 }
  0xf9   :  { %v497_v9 = vperm.slane %v493_v6, 1  ;;  %v498_v10 = vrot.slane %v495_v7, 4  ;;  %v496_v11 = vperm.slane %v493_v6, 0 }
  0xfb   :  { %v499_v12 = vrot.slane %v497_v9, 4  ;;  %v500_v13 = vsel %vm63_vm0, %v494_v8, %v498_v10 }
  0xfc   :  { %v504_v14 = vmul.f32 %v500_v13, %v665_v60 }
  0xfd   :  { %v501_v15 = vsel %vm63_vm0, %v496_v11, %v499_v12 }
  0xfe   :  { %v505_v16 = vmul.f32 %v501_v15, %v667_v63  ;;  %506 = vst [vmem:[#allocation8] sm:$0xff] %v504_v14 }
 0x100   :  { %507 = vst [vmem:[#allocation8 + $0x8] sm:$0xff] %v505_v16 }
 0x101   :  { %520 = dma.vmem_to_hbm [thread:$0]  %s513_s26, 256, %s515_s29, [#allocation5], %s630_s24, %s630_s24, %s631_s25  }
 0x102   :  { %624 = dma.done.wait [#allocation5], 256  }
 0x103   :  { %625 = vsyncadd [#allocation5], 4294967040 }
 0x104   :  { %525 = vsyncpa [#allocation4], 1 }
 0x105   :  { %526 = vsyncpa [#allocation7], 1 }
 0x106   :  { %527 = vsyncpa [#allocation5], 1 }

</bundles_post_ra>
